<compile_context>
chip_gen: v7x
topology: tpu7x:2x2x1
jax: 0.10.0
libtpu: 0.0.40
codegen_flags: <defaults>
</compile_context>

<pallas_src>
import functools
import math

import jax
import jax.numpy as jnp
from jax.experimental import pallas as pl
from jax.experimental.pallas import tpu as pltpu


def sphere_margin_kernel(lab_ref, lam_ref, x_ref, xnorm_ref, xinv_ref,
                         labv_ref, wt_ref, out_ref, *, m, tile_c, batch):
    lam = lam_ref[0]            # cur_lambda
    inv_1p_lam = lam_ref[1]     # 1 / (1 + cur_lambda), precomputed scalar

    x = x_ref[...].astype(jnp.float32)         # [B, D]   (resident)
    wt = wt_ref[...].astype(jnp.float32)       # [D, Tc]  (streamed from HBM)
    x_norm = xnorm_ref[...]                    # [B, 1]   ||x||_2
    x_inv = xinv_ref[...]                      # [B, 1]   1 / max(||x||, 1e-12)

    # Per-class inverse weight norm: reduce the raw tile and fold the rescale
    # into the small [B, Tc] matmul result (cheaper than scaling [D, Tc]).
    w_sumsq = jnp.sum(wt * wt, axis=0, keepdims=True)              # [1, Tc]
    w_inv = jax.lax.rsqrt(jnp.maximum(w_sumsq, 1e-24))             # EUP, no divide

    dots = jnp.dot(x, wt, preferred_element_type=jnp.float32)      # MXU [B, Tc]
    cos_theta = jnp.clip(dots * (x_inv * w_inv), -1.0, 1.0)
    base = cos_theta * x_norm            # non-label columns: cos_theta * ||x||

    # --- does any label land in this class tile?  (scalar SMEM work only) ---
    c_start = pl.program_id(0) * tile_c
    tile_has_label = jnp.bool_(False)
    for i in range(batch):               # batch is static & small -> unrolled
        li = lab_ref[i]
        tile_has_label = jnp.logical_or(
            tile_has_label,
            jnp.logical_and(li >= c_start, li < c_start + tile_c))

    @pl.when(jnp.logical_not(tile_has_label))
    def _():
        out_ref[...] = base.astype(out_ref.dtype)

    @pl.when(tile_has_label)
    def _():
        c = cos_theta
        # margin_formula[m](cos_theta) == cos(m * theta)  (Chebyshev polynomials)
        if m == 1:
            cos_m_theta = c
        elif m == 2:
            cos_m_theta = 2.0 * c * c - 1.0
        elif m == 3:
            cos_m_theta = (4.0 * c * c - 3.0) * c
        else:  # m == 4
            c2 = c * c
            cos_m_theta = 8.0 * c2 * c2 - 8.0 * c2 + 1.0

        # k = floor(m * acos(c) / pi) via quadrant-threshold counting
        # (acos monotone decreasing => theta >= j*pi/m  <=>  c <= cos(j*pi/m)).
        k_int = jnp.zeros(c.shape, dtype=jnp.int32)
        for j in range(1, m + 1):
            thr = math.cos(j * math.pi / m)
            k_int = k_int + (c <= jnp.float32(thr)).astype(jnp.int32)
        k = k_int.astype(jnp.float32)
        sign = jnp.where((k_int & 1) == 0, jnp.float32(1.0), jnp.float32(-1.0))

        phi_theta = sign * cos_m_theta - 2.0 * k
        phi_theta_ = (lam * c + phi_theta) * inv_1p_lam

        # One-hot blend without materializing one_hot; NOTE the GLOBAL column
        # offset (tile-local iota + c_start) so the margin hits the right class.
        col = jax.lax.broadcasted_iota(jnp.int32, c.shape, 1) + c_start
        is_label = col == labv_ref[...]                            # [B,Tc] vs [B,1]
        out_ref[...] = (jnp.where(is_label, phi_theta_, c) * x_norm
                        ).astype(out_ref.dtype)


def _tpu_vmem_capacity_bytes():
    try:
        return int(pltpu.get_tpu_info().vmem_capacity_bytes)
    except Exception:
        return 64 * 1024 * 1024    # v7x per-TensorCore VMEM (smallest generation)


def _pick_tile_c(C, D, B, budget_bytes, max_tile_c=4096):
    """Largest class tile that divides C, is a multiple of 128 and keeps the
    double-buffered W tile + output tile under the VMEM budget."""
    if C % 128 != 0:
        return C                   # single full-width block (exempt from 128 rule)

    def tile_bytes(t):
        return 2 * t * D * 4 + 2 * B * t * 4   # 2x-buffered f32 W + out tiles

    tile = max_tile_c
    while tile > 128 and (C % tile != 0 or tile_bytes(tile) > budget_bytes):
        tile //= 2
    return min(tile, C)


def sphere_margin_forward(x, weight, label, cur_lambda, *, m=4, tile_c=None):
    assert m in (1, 2, 3, 4), "margin should be 1, 2, 3 or 4"
    B, D = x.shape
    C, D2 = weight.shape
    assert D == D2

    vmem_cap = _tpu_vmem_capacity_bytes()
    if tile_c is None:
        tile_c = _pick_tile_c(C, D, B, budget_bytes=vmem_cap // 4)
    assert C % tile_c == 0, "tile_c must divide out_feature"
    num_tiles = C // tile_c

    x32 = x.astype(jnp.float32)
    # x-side work hoisted out of the per-class-tile loop (tiny [B, D] op).
    x_sumsq = jnp.sum(x32 * x32, axis=1, keepdims=True)            # [B, 1]
    x_norm = jnp.sqrt(x_sumsq)                                     # ||x||_2
    x_inv = jax.lax.rsqrt(jnp.maximum(x_sumsq, 1e-24))             # 1/max(||x||,1e-12)

    # Present W pre-transposed (layout plumbing): MXU sees a plain [B,D]x[D,Tc].
    wt = weight.astype(jnp.float32).T                              # [D, C]

    labels_i32 = label.reshape(-1).astype(jnp.int32)               # [B]   SMEM gate
    label_vec = labels_i32.reshape(B, 1)                           # [B,1] VMEM compare
    lam_params = jnp.asarray(
        [cur_lambda, 1.0 / (1.0 + cur_lambda)], dtype=jnp.float32)

    grid_spec = pltpu.PrefetchScalarGridSpec(
        num_scalar_prefetch=1,                                     # labels -> SMEM
        grid=(num_tiles,),
        in_specs=[
            pl.BlockSpec(memory_space=pltpu.MemorySpace.SMEM),     # lam params
            pl.BlockSpec((B, D), lambda j, lab: (0, 0)),           # x (resident)
            pl.BlockSpec((B, 1), lambda j, lab: (0, 0)),           # ||x||
            pl.BlockSpec((B, 1), lambda j, lab: (0, 0)),           # 1/||x||
            pl.BlockSpec((B, 1), lambda j, lab: (0, 0)),           # labels (VMEM)
            pl.BlockSpec((D, tile_c), lambda j, lab: (0, j)),      # W.T tile (streamed)
        ],
        out_specs=pl.BlockSpec((B, tile_c), lambda j, lab: (0, j)),
    )

    kernel = functools.partial(sphere_margin_kernel, m=m, tile_c=tile_c, batch=B)

    return pl.pallas_call(
        kernel,
        out_shape=jax.ShapeDtypeStruct((B, C), jnp.float32),
        grid_spec=grid_spec,
        compiler_params=pltpu.CompilerParams(
            dimension_semantics=("parallel",),                     # megacore on v7x
            vmem_limit_bytes=min(vmem_cap // 2, 128 * 1024 * 1024),
        ),
    )(labels_i32, lam_params, x32, x_norm, x_inv, label_vec, wt)


def reference_forward(x, weight, label, cur_lambda, m=4):
    """Pure-JAX reference mirroring the (intended) PyTorch forward."""
    x = x.astype(jnp.float32)
    w = weight.astype(jnp.float32)
    x_n = x / jnp.maximum(jnp.linalg.norm(x, axis=1, keepdims=True), 1e-12)
    w_n = w / jnp.maximum(jnp.linalg.norm(w, axis=1, keepdims=True), 1e-12)
    cos_theta = jnp.clip(x_n @ w_n.T, -1.0, 1.0)
    formulas = {
        1: lambda z: z,
        2: lambda z: 2 * z ** 2 - 1,
        3: lambda z: 4 * z ** 3 - 3 * z,
        4: lambda z: 8 * z ** 4 - 8 * z ** 2 + 1,
    }
    cos_m_theta = formulas[m](cos_theta)
    theta = jnp.arccos(cos_theta)
    k = jnp.floor(m * theta / jnp.pi)
    phi_theta = ((-1.0) ** k) * cos_m_theta - 2 * k
    phi_theta_ = (cur_lambda * cos_theta + phi_theta) / (1 + cur_lambda)
    norm_of_feature = jnp.linalg.norm(x, axis=1, keepdims=True)
    one_hot = jax.nn.one_hot(label, cos_theta.shape[1], dtype=jnp.float32)
    out = one_hot * phi_theta_ + (1 - one_hot) * cos_theta
    return out * norm_of_feature


if __name__ == "__main__":
    # Module hyperparameters
    in_feature, out_feature = 64, 512
    m, base, gamma, power, lambda_min = 4, 1000.0, 0.0001, 2, 5.0

    # forward() increments iter -> first call sees iter = 1
    it = 1
    cur_lambda = max(lambda_min, base * (1 + gamma * it) ** (-power))

    key = jax.random.PRNGKey(0)
    kx, kw = jax.random.split(key, 2)

    B = 8
    x = jax.random.normal(kx, (B, in_feature), dtype=jnp.float32)

    # nn.init.xavier_uniform_ on a (out_feature, in_feature) weight
    bound = math.sqrt(6.0 / (in_feature + out_feature))
    weight = jax.random.uniform(
        kw, (out_feature, in_feature), dtype=jnp.float32,
        minval=-bound, maxval=bound)

    # Deterministic labels chosen so at least one class tile has no label
    # (exercises the pl.when fast path) while several tiles do (margin path).
    label = jnp.array([3, 64, 127, 260, 300, 390, 400, 500], dtype=jnp.int32)

    # tile_c=128 -> 4-step grid, exercises streaming / double-buffering of W.
    out = sphere_margin_forward(x, weight, label, cur_lambda, m=m, tile_c=128)
    out = jax.block_until_ready(out)

    ref = reference_forward(x, weight, label, cur_lambda, m=m)
    assert out.shape == (B, out_feature)
    assert jnp.allclose(out, ref, atol=2e-4, rtol=2e-4), "mismatch vs reference"

    print("KERNEL_OK")
</pallas_src>

<mosaic_0001>
module attributes {stable_mosaic.version = 11 : i64} {
  func.func @sphere_margin_kernel(%arg0: i32, %arg1: memref<8xi32, #tpu.memory_space<smem>>, %arg2: memref<2xf32, #tpu.memory_space<smem>>, %arg3: memref<8x64xf32, #tpu.memory_space<vmem>>, %arg4: memref<8x1xf32, #tpu.memory_space<vmem>>, %arg5: memref<8x1xf32, #tpu.memory_space<vmem>>, %arg6: memref<8x1xi32, #tpu.memory_space<vmem>>, %arg7: memref<64x128xf32, #tpu.memory_space<vmem>>, %arg8: memref<8x128xf32, #tpu.memory_space<vmem>>) attributes {dimension_semantics = [#tpu.dimension_semantics<parallel>], iteration_bounds = array<i64: 4>, scalar_prefetch = 1 : i64, scratch_operands = 0 : i64, tpu.core_type = #tpu.core_type<tc>, window_params = [{transform_indices = @transform_0, window_bounds = array<i64: 2>}, {pipeline_mode = #tpu.pipeline_mode<synchronous>, transform_indices = @transform_1, window_bounds = array<i64: 8, 64>}, {pipeline_mode = #tpu.pipeline_mode<synchronous>, transform_indices = @transform_2, window_bounds = array<i64: 8, 1>}, {pipeline_mode = #tpu.pipeline_mode<synchronous>, transform_indices = @transform_3, window_bounds = array<i64: 8, 1>}, {pipeline_mode = #tpu.pipeline_mode<synchronous>, transform_indices = @transform_4, window_bounds = array<i64: 8, 1>}, {transform_indices = @transform_5, window_bounds = array<i64: 64, 128>}, {transform_indices = @transform_6, window_bounds = array<i64: 8, 128>}]} {
    %c0 = arith.constant 0 : index
    %0 = memref.load %arg2[%c0] : memref<2xf32, #tpu.memory_space<smem>>
    %c1 = arith.constant 1 : index
    %1 = memref.load %arg2[%c1] : memref<2xf32, #tpu.memory_space<smem>>
    %c0_0 = arith.constant 0 : index
    %c0_1 = arith.constant 0 : index
    %2 = vector.load %arg3[%c0_0, %c0_1] : memref<8x64xf32, #tpu.memory_space<vmem>>, vector<8x64xf32>
    %c0_2 = arith.constant 0 : index
    %c0_3 = arith.constant 0 : index
    %3 = vector.load %arg7[%c0_2, %c0_3] : memref<64x128xf32, #tpu.memory_space<vmem>>, vector<64x128xf32>
    %c0_4 = arith.constant 0 : index
    %c0_5 = arith.constant 0 : index
    %4 = vector.load %arg4[%c0_4, %c0_5] : memref<8x1xf32, #tpu.memory_space<vmem>>, vector<8x1xf32>
    %c0_6 = arith.constant 0 : index
    %c0_7 = arith.constant 0 : index
    %5 = vector.load %arg5[%c0_6, %c0_7] : memref<8x1xf32, #tpu.memory_space<vmem>>, vector<8x1xf32>
    %6 = arith.mulf %3, %3 : vector<64x128xf32>
    %cst = arith.constant dense<0.000000e+00> : vector<128xf32>
    %7 = vector.multi_reduction <add>, %6, %cst [0] : vector<64x128xf32> to vector<128xf32>
    %8 = vector.shape_cast %7 : vector<128xf32> to vector<1x128xf32>
    %cst_8 = arith.constant 1.000000e-24 : f32
    %9 = vector.broadcast %cst_8 : f32 to vector<1x128xf32>
    %10 = arith.maximumf %8, %9 : vector<1x128xf32>
    %11 = math.rsqrt %10 : vector<1x128xf32>
    %cst_9 = arith.constant dense<0.000000e+00> : vector<8x128xf32>
    %12 = tpu.matmul %2, %3, %cst_9 {dimension_numbers = #tpu.dot_dimension_numbers<[1], [0], [0], [1], [0, 0, 1, 1], [], []>} : vector<8x64xf32>, vector<64x128xf32>, vector<8x128xf32> -> vector<8x128xf32>
    %13 = vector.broadcast %5 : vector<8x1xf32> to vector<8x128xf32>
    %14 = vector.broadcast %11 : vector<1x128xf32> to vector<8x128xf32>
    %15 = arith.mulf %13, %14 : vector<8x128xf32>
    %16 = arith.mulf %12, %15 : vector<8x128xf32>
    %cst_10 = arith.constant -1.000000e+00 : f32
    %cst_11 = arith.constant 1.000000e+00 : f32
    %17 = vector.broadcast %cst_10 : f32 to vector<8x128xf32>
    %18 = arith.maximumf %17, %16 : vector<8x128xf32>
    %19 = vector.broadcast %cst_11 : f32 to vector<8x128xf32>
    %20 = arith.minimumf %19, %18 : vector<8x128xf32>
    %21 = vector.broadcast %4 : vector<8x1xf32> to vector<8x128xf32>
    %22 = arith.mulf %20, %21 : vector<8x128xf32>
    %c128_i32 = arith.constant 128 : i32
    %23 = arith.muli %arg0, %c128_i32 : i32
    %c0_12 = arith.constant 0 : index
    %24 = memref.load %arg1[%c0_12] : memref<8xi32, #tpu.memory_space<smem>>
    %25 = arith.cmpi sge, %24, %23 : i32
    %c128_i32_13 = arith.constant 128 : i32
    %26 = arith.addi %23, %c128_i32_13 : i32
    %27 = arith.cmpi slt, %24, %26 : i32
    %28 = arith.andi %25, %27 : i1
    %false = arith.constant false
    %29 = arith.ori %false, %28 : i1
    %c1_14 = arith.constant 1 : index
    %30 = memref.load %arg1[%c1_14] : memref<8xi32, #tpu.memory_space<smem>>
    %31 = arith.cmpi sge, %30, %23 : i32
    %c128_i32_15 = arith.constant 128 : i32
    %32 = arith.addi %23, %c128_i32_15 : i32
    %33 = arith.cmpi slt, %30, %32 : i32
    %34 = arith.andi %31, %33 : i1
    %35 = arith.ori %29, %34 : i1
    %c2 = arith.constant 2 : index
    %36 = memref.load %arg1[%c2] : memref<8xi32, #tpu.memory_space<smem>>
    %37 = arith.cmpi sge, %36, %23 : i32
    %c128_i32_16 = arith.constant 128 : i32
    %38 = arith.addi %23, %c128_i32_16 : i32
    %39 = arith.cmpi slt, %36, %38 : i32
    %40 = arith.andi %37, %39 : i1
    %41 = arith.ori %35, %40 : i1
    %c3 = arith.constant 3 : index
    %42 = memref.load %arg1[%c3] : memref<8xi32, #tpu.memory_space<smem>>
    %43 = arith.cmpi sge, %42, %23 : i32
    %c128_i32_17 = arith.constant 128 : i32
    %44 = arith.addi %23, %c128_i32_17 : i32
    %45 = arith.cmpi slt, %42, %44 : i32
    %46 = arith.andi %43, %45 : i1
    %47 = arith.ori %41, %46 : i1
    %c4 = arith.constant 4 : index
    %48 = memref.load %arg1[%c4] : memref<8xi32, #tpu.memory_space<smem>>
    %49 = arith.cmpi sge, %48, %23 : i32
    %c128_i32_18 = arith.constant 128 : i32
    %50 = arith.addi %23, %c128_i32_18 : i32
    %51 = arith.cmpi slt, %48, %50 : i32
    %52 = arith.andi %49, %51 : i1
    %53 = arith.ori %47, %52 : i1
    %c5 = arith.constant 5 : index
    %54 = memref.load %arg1[%c5] : memref<8xi32, #tpu.memory_space<smem>>
    %55 = arith.cmpi sge, %54, %23 : i32
    %c128_i32_19 = arith.constant 128 : i32
    %56 = arith.addi %23, %c128_i32_19 : i32
    %57 = arith.cmpi slt, %54, %56 : i32
    %58 = arith.andi %55, %57 : i1
    %59 = arith.ori %53, %58 : i1
    %c6 = arith.constant 6 : index
    %60 = memref.load %arg1[%c6] : memref<8xi32, #tpu.memory_space<smem>>
    %61 = arith.cmpi sge, %60, %23 : i32
    %c128_i32_20 = arith.constant 128 : i32
    %62 = arith.addi %23, %c128_i32_20 : i32
    %63 = arith.cmpi slt, %60, %62 : i32
    %64 = arith.andi %61, %63 : i1
    %65 = arith.ori %59, %64 : i1
    %c7 = arith.constant 7 : index
    %66 = memref.load %arg1[%c7] : memref<8xi32, #tpu.memory_space<smem>>
    %67 = arith.cmpi sge, %66, %23 : i32
    %c128_i32_21 = arith.constant 128 : i32
    %68 = arith.addi %23, %c128_i32_21 : i32
    %69 = arith.cmpi slt, %66, %68 : i32
    %70 = arith.andi %67, %69 : i1
    %71 = arith.ori %65, %70 : i1
    %true = arith.constant true
    %72 = arith.xori %71, %true : i1
    %73 = arith.extui %72 : i1 to i32
    %c0_i32 = arith.constant 0 : i32
    %74 = arith.cmpi ne, %73, %c0_i32 : i32
    scf.if %74 {
      %c0_23 = arith.constant 0 : index
      %c0_24 = arith.constant 0 : index
      %77 = vector.load %arg8[%c0_23, %c0_24] : memref<8x128xf32, #tpu.memory_space<vmem>>, vector<8x128xf32>
      tpu.vector_store %arg8[%c0_23, %c0_24], %22 {strides = array<i32>} : memref<8x128xf32, #tpu.memory_space<vmem>>, vector<8x128xf32>,
    } else {
    }
    %75 = arith.extui %71 : i1 to i32
    %c0_i32_22 = arith.constant 0 : i32
    %76 = arith.cmpi ne, %75, %c0_i32_22 : i32
    scf.if %76 {
      %77 = arith.mulf %20, %20 : vector<8x128xf32>
      %cst_23 = arith.constant 8.000000e+00 : f32
      %78 = vector.broadcast %cst_23 : f32 to vector<8x128xf32>
      %79 = arith.mulf %78, %77 : vector<8x128xf32>
      %80 = arith.mulf %79, %77 : vector<8x128xf32>
      %cst_24 = arith.constant 8.000000e+00 : f32
      %81 = vector.broadcast %cst_24 : f32 to vector<8x128xf32>
      %82 = arith.mulf %81, %77 : vector<8x128xf32>
      %83 = arith.subf %80, %82 : vector<8x128xf32>
      %cst_25 = arith.constant 1.000000e+00 : f32
      %84 = vector.broadcast %cst_25 : f32 to vector<8x128xf32>
      %85 = arith.addf %83, %84 : vector<8x128xf32>
      %c0_i32_26 = arith.constant 0 : i32
      %86 = vector.broadcast %c0_i32_26 : i32 to vector<8x128xi32>
      %cst_27 = arith.constant 0.707106769 : f32
      %87 = vector.broadcast %cst_27 : f32 to vector<8x128xf32>
      %88 = arith.cmpf ole, %20, %87 : vector<8x128xf32>
      %89 = arith.extui %88 : vector<8x128xi1> to vector<8x128xi32>
      %90 = arith.addi %86, %89 : vector<8x128xi32>
      %cst_28 = arith.constant 6.12323426E-17 : f32
      %91 = vector.broadcast %cst_28 : f32 to vector<8x128xf32>
      %92 = arith.cmpf ole, %20, %91 : vector<8x128xf32>
      %93 = arith.extui %92 : vector<8x128xi1> to vector<8x128xi32>
      %94 = arith.addi %90, %93 : vector<8x128xi32>
      %cst_29 = arith.constant -0.707106769 : f32
      %95 = vector.broadcast %cst_29 : f32 to vector<8x128xf32>
      %96 = arith.cmpf ole, %20, %95 : vector<8x128xf32>
      %97 = arith.extui %96 : vector<8x128xi1> to vector<8x128xi32>
      %98 = arith.addi %94, %97 : vector<8x128xi32>
      %cst_30 = arith.constant -1.000000e+00 : f32
      %99 = vector.broadcast %cst_30 : f32 to vector<8x128xf32>
      %100 = arith.cmpf ole, %20, %99 : vector<8x128xf32>
      %101 = arith.extui %100 : vector<8x128xi1> to vector<8x128xi32>
      %102 = arith.addi %98, %101 : vector<8x128xi32>
      %103 = arith.sitofp %102 : vector<8x128xi32> to vector<8x128xf32>
      %c1_i32 = arith.constant 1 : i32
      %104 = vector.broadcast %c1_i32 : i32 to vector<8x128xi32>
      %105 = arith.andi %102, %104 : vector<8x128xi32>
      %c0_i32_31 = arith.constant 0 : i32
      %106 = vector.broadcast %c0_i32_31 : i32 to vector<8x128xi32>
      %107 = arith.cmpi eq, %105, %106 : vector<8x128xi32>
      %cst_32 = arith.constant 1.000000e+00 : f32
      %cst_33 = arith.constant -1.000000e+00 : f32
      %108 = vector.broadcast %cst_32 : f32 to vector<8x128xf32>
      %109 = vector.broadcast %cst_33 : f32 to vector<8x128xf32>
      %110 = arith.select %107, %108, %109 : vector<8x128xi1>, vector<8x128xf32>
      %111 = arith.mulf %110, %85 : vector<8x128xf32>
      %cst_34 = arith.constant 2.000000e+00 : f32
      %112 = vector.broadcast %cst_34 : f32 to vector<8x128xf32>
      %113 = arith.mulf %112, %103 : vector<8x128xf32>
      %114 = arith.subf %111, %113 : vector<8x128xf32>
      %115 = vector.broadcast %0 : f32 to vector<8x128xf32>
      %116 = arith.mulf %115, %20 : vector<8x128xf32>
      %117 = arith.addf %116, %114 : vector<8x128xf32>
      %118 = vector.broadcast %1 : f32 to vector<8x128xf32>
      %119 = arith.mulf %117, %118 : vector<8x128xf32>
      %120 = tpu.iota {dimensions = array<i32: 1>} : vector<8x128xi32>
      %121 = vector.broadcast %23 : i32 to vector<8x128xi32>
      %122 = arith.addi %120, %121 : vector<8x128xi32>
      %c0_35 = arith.constant 0 : index
      %c0_36 = arith.constant 0 : index
      %123 = vector.load %arg6[%c0_35, %c0_36] : memref<8x1xi32, #tpu.memory_space<vmem>>, vector<8x1xi32>
      %124 = vector.broadcast %123 : vector<8x1xi32> to vector<8x128xi32>
      %125 = arith.cmpi eq, %122, %124 : vector<8x128xi32>
      %126 = arith.select %125, %119, %20 : vector<8x128xi1>, vector<8x128xf32>
      %127 = vector.broadcast %4 : vector<8x1xf32> to vector<8x128xf32>
      %128 = arith.mulf %126, %127 : vector<8x128xf32>
      %c0_37 = arith.constant 0 : index
      %c0_38 = arith.constant 0 : index
      %129 = vector.load %arg8[%c0_37, %c0_38] : memref<8x128xf32, #tpu.memory_space<vmem>>, vector<8x128xf32>
      tpu.vector_store %arg8[%c0_37, %c0_38], %128 {strides = array<i32>} : memref<8x128xf32, #tpu.memory_space<vmem>>, vector<8x128xf32>,
    } else {
    }
    return
  }
  func.func @transform_0(%arg0: i32, %arg1: memref<8xi32, #tpu.memory_space<smem>>) -> i32 {
    %c0_i32 = arith.constant 0 : i32
    %c0_i32_0 = arith.constant 0 : i32
    return %c0_i32 : i32
  }
  func.func @transform_1(%arg0: i32, %arg1: memref<8xi32, #tpu.memory_space<smem>>) -> (i32, i32) {
    %c0_i32 = arith.constant 0 : i32
    %c0_i32_0 = arith.constant 0 : i32
    %c0_i32_1 = arith.constant 0 : i32
    return %c0_i32, %c0_i32_0 : i32, i32
  }
  func.func @transform_2(%arg0: i32, %arg1: memref<8xi32, #tpu.memory_space<smem>>) -> (i32, i32) {
    %c0_i32 = arith.constant 0 : i32
    %c0_i32_0 = arith.constant 0 : i32
    %c0_i32_1 = arith.constant 0 : i32
    return %c0_i32, %c0_i32_0 : i32, i32
  }
  func.func @transform_3(%arg0: i32, %arg1: memref<8xi32, #tpu.memory_space<smem>>) -> (i32, i32) {
    %c0_i32 = arith.constant 0 : i32
    %c0_i32_0 = arith.constant 0 : i32
    %c0_i32_1 = arith.constant 0 : i32
    return %c0_i32, %c0_i32_0 : i32, i32
  }
  func.func @transform_4(%arg0: i32, %arg1: memref<8xi32, #tpu.memory_space<smem>>) -> (i32, i32) {
    %c0_i32 = arith.constant 0 : i32
    %c0_i32_0 = arith.constant 0 : i32
    %c0_i32_1 = arith.constant 0 : i32
    return %c0_i32, %c0_i32_0 : i32, i32
  }
  func.func @transform_5(%arg0: i32, %arg1: memref<8xi32, #tpu.memory_space<smem>>) -> (i32, i32) {
    %c0_i32 = arith.constant 0 : i32
    %c0_i32_0 = arith.constant 0 : i32
    return %c0_i32, %arg0 : i32, i32
  }
  func.func @transform_6(%arg0: i32, %arg1: memref<8xi32, #tpu.memory_space<smem>>) -> (i32, i32) {
    %c0_i32 = arith.constant 0 : i32
    %c0_i32_0 = arith.constant 0 : i32
    return %c0_i32, %arg0 : i32, i32
  }
}

</mosaic_0001>

<bundles_post_ra>
// kernel: tpu_custom_call.1
= control target key start
LH: loop header
LB: loop body
LE: loop exit
PB: predicated region body
PF: predicated region fallthrough
CT: control target
= control target key end

     0   :  { %s1176_s0 = inlined_call_operand.vmem [shape: s32[8], index: 0, kind: input, shape index: {}]   ;;  %s1177_s1 = inlined_call_operand.vmem [shape: f32[2], index: 1, kind: input, shape index: {}]   ;;  %s1178_s2 = inlined_call_operand.vmem [shape: f32[8,64], index: 2, kind: input, shape index: {}]   ;;  %s1179_s3 = inlined_call_operand.vmem [shape: f32[8,1], index: 3, kind: input, shape index: {}]   ;;  %s1180_s4 = inlined_call_operand.vmem [shape: f32[8,1], index: 4, kind: input, shape index: {}]   ;;  %s1181_s5 = inlined_call_operand.vmem [shape: s32[8,1], index: 5, kind: input, shape index: {}]   ;;  %s1182_s6 = inlined_call_operand.hbm [shape: f32[64,512], index: 6, kind: input, shape index: {}]   ;;  %s1183_s7 = inlined_call_operand.hbm [shape: f32[8,512], index: 7, kind: output, shape index: {}]  }
   0x1   :  { %s12_s26 = sshll.u32 %s1176_s0, 4  ;;  %s13_s26 = int_to_ptr.vmem [resolvable:$true] %s12_s26 }
   0x2   :  { %s743_s27 = scalar_lea.vmem %s13_s26, 16  ;;  %p748_p1 = scmp.lt.s32.totalorder %s13_s26, %s13_s26 }
   0x3   :  { %p744_p0 = scmp.ne.s32.totalorder %s13_s26, %s743_s27  ;;  %p749_p2 = scmp.lt.s32.totalorder %s743_s27, %s743_s27 }
   0x5   :  { %p750_p3 = por %p749_p2, %p748_p1 }
   0x7   :  { %p751_p4 = pnand %p750_p3, %p744_p0 }
   0x9   :  { %754 = shalt.err (!%p751_p4)  }
   0xa   :  { %s874_s28 = smov [#allocation3]  }
   0xb   :  { %15 = dma.vmem_to_smem %s13_s26, 16, %s874_s28, [#allocation2] }
   0xc   :  { %844 = dma.done.wait [#allocation2], 16 }
   0xd   :  { %845 = vsyncadd [#allocation2], 4294967280 }
   0xe   :  { %17 = sfence }
   0xf   :  { %18 = vsyncpa [#allocation7], 0 }
  0x10   :  { %19 = vsyncpa [#allocation5], 0 }
  0x11   :  { %21 = vsyncpa [#allocation5 + $0x1], 0 }
  0x12   :  { %22 = vsyncpa [#allocation6], 0 }
  0x13   :  { %24 = vsyncpa [#allocation6 + $0x1], 0  ;;  %s930_s29 = smov 0   ;;  %s932_s0 = smov 0  }
  0x14   :  { %s934_s30 = smov 0   ;;  %s936_s8 = smov 0  }
  0x15 LB: > { %s951_s9 = sadd.s32 4294967295, %s872_s8   ;;  %s607_s10 = sadd.s32 4294967294, %s872_s8   ;;  %s872_s8 = sphi %s936_s8, %s1203_s8   ;;  %s868_s30 = sphi %s934_s30, %s1202_s30   ;;  %s864_s0 = sphi %s932_s0, %s1201_s0   ;;  %s860_s29 = sphi %s930_s29, %s1200_s29  }
  0x16   : > { %s955_s11 = sadd.s32 1, %s872_s8   ;;  %s142_s12 = sadd.s32 1, %s868_s30 }
  0x17   : > { %s139_s13 = ssub.s32 %s872_s8, %s955_s11  ;;  %p149_p5 = scmp.ne.s32.totalorder %s868_s30, %s864_s0 }
  0x18   : > { %p140_p6 = scmp.eq.s32.totalorder %s139_s13, 0  ;;  %p150_p7 = scmp.eq.s32.totalorder %s872_s8, 0 }
  0x19   : > { %p155_p8 = scmp.ne.s32.totalorder %s864_s0, %s860_s29  ;;  %p1185_p9 = scmp.eq.s32.totalorder %s951_s9, 0 }
  0x1a   : > { %s967_s14 = scalar_select %p140_p6, %s868_s30, %s142_s12  }
  0x1b   : > { %p969_p10 = por %p150_p7, %p149_p5  ;;  %p975_p11 = por %p1185_p9, %p155_p8 }
  0x1c   : > { %p179_p12 = scmp.eq.s32.totalorder %s951_s9, 3  ;;  %p185_p13 = scmp.eq.s32.totalorder %s607_s10, 3 }
  0x1d   : > { %s1188_s16 = scalar_select %p975_p11, 1, 0 }
  0x1e   : > { %p608_p0 = scmp.ge.s32.totalorder %s872_s8, 1  ;;  %p192_p1 = scmp.lt.s32.totalorder %s872_s8, 5 }
  0x1f   : > { %p982_p2 = por %p179_p12, %p149_p5  ;;  %p986_p3 = por %p185_p13, %p155_p8 }
  0x20   : > { %p990_p4 = pnand %p608_p0, %p192_p1  ;;  %s205_s22 = sshll.u32 %s1177_s1, 4  ;;  %s206_s22 = int_to_ptr.vmem [resolvable:$true] %s205_s22 }
  0x21   : > { %s1189_s17 = scalar_select %p982_p2, 1, 0 }
  0x22   : > { %s1190_s18 = scalar_select %p986_p3, 1, 0 }
  0x23   : > { %p680_p6 = pneg %p990_p4  ;;  %p693_p5 = scmp.lt.s32.totalorder %s872_s8, 4 }
  0x24   : > { %s228_s24 = sand.u32 1, %s868_s30   ;;  %s755_s27 = scalar_lea.vmem %s206_s22, 16 }
  0x25   : > { %p1002_p7 = pnand %p680_p6, %p1185_p9  ;;  %p1009_p8 = pnand %p693_p5, %p969_p10 }
  0x26   : > { %s611_s26 = sshll.u32 %s228_s24, 6  ;;  %p756_p12 = scmp.ne.s32.totalorder %s206_s22, %s755_s27 }
  0x27   : > { %p757_p13 = pneg %p1002_p7  ;;  %p763_p3 = scmp.lt.s32.totalorder %s206_s22, %s206_s22 }
  0x28   : > { %p764_p2 = scmp.lt.s32.totalorder %s755_s27, %s755_s27 }
  0x29   : > { %p758_p0 = pnand %p757_p13, %p756_p12 }
  0x2a   : > { %p765_p6 = por %p764_p2, %p763_p3 }
  0x2b   : > { %p759_p1 = pneg %p758_p0 }
  0x2d   : > { %p766_p9 = pnand %p765_p6, %p759_p1 }
  0x2f   : > { %769 = shalt.err (!%p766_p9)
}
  0x30   : > { %s875_s28 = smov [#allocation4]   ;;  %s612_s10 = sshll.u32 %s872_s8, 7 }
  0x31   : > { %683 = dma.vmem_to_smem (!%p1002_p7), %s206_s22, 16, %s875_s28, [#allocation7]  }
  0x32   : > { %s232_s12 = scalar_lea.vmem [#allocation8], %s611_s26  ;;  %s1021_s21 = scalar_lea.hbm %s1182_s6, %s612_s10 }
  0x33   : > { %s238_s13 = sshll.u32 %s232_s12, 4  ;;  %s1025_s27 = scalar_lea.sflag [#allocation5], %s228_s24  ;;  %s1023_s13 = int_to_ptr.vmem [resolvable:$true] %s238_s13 }
  0x34   : > { %s770_s23 = scalar_lea.hbm %s1021_s21, 1024  ;;  %p772_p10 = pneg %p1009_p8 }
  0x35   : > { %p771_p9 = scmp.ne.s32.totalorder %s1021_s21, %s770_s23  ;;  %s775_s28 = scalar_lea.hbm %s1182_s6, 4096 }
  0x36   : > { %p776_p5 = scmp.lt.u32.totalorder %s1021_s21, %s1182_s6  ;;  %p777_p7 = scmp.lt.u32.totalorder %s775_s28, %s770_s23 }
  0x37   : > { %p773_p2 = pnand %p772_p10, %p771_p9  ;;  %p779_p13 = scmp.lt.u32.totalorder %s770_s23, %s1021_s21 }
  0x38   : > { %p778_p12 = por %p777_p7, %p776_p5 }
  0x39   : > { %p774_p3 = pneg %p773_p2 }
  0x3a   : > { %p780_p0 = por %p779_p13, %p778_p12 }
  0x3c   : > { %p781_p1 = pnand %p780_p0, %p774_p3 }
  0x3e   : > { %784 = shalt.err (!%p781_p1)
}
  0x3f   : > { %s785_s24 = scalar_lea.vmem %s1023_s13, 1024  ;;  %s876_s15 = smov [#allocation8]  }
  0x40   : > { %p786_p6 = scmp.ne.s32.totalorder %s1023_s13, %s785_s24  ;;  %s790_s20 = sshll.u32 %s876_s15, 4  ;;  %s791_s20 = int_to_ptr.vmem [resolvable:$false] %s790_s20 }
  0x41   : > { %s792_s22 = scalar_lea.vmem %s791_s20, 2048  ;;  %p793_p11 = scmp.lt.s32.totalorder %s1023_s13, %s791_s20 }
  0x42   : > { %p788_p9 = pnand %p786_p6, %p772_p10  ;;  %p794_p5 = scmp.lt.s32.totalorder %s792_s22, %s785_s24 }
  0x44   : > { %p789_p2 = pneg %p788_p9  ;;  %p795_p7 = por %p794_p5, %p793_p11 }
  0x46   : > { %p796_p12 = pnand %p795_p7, %p789_p2 }
  0x48   : > { %799 = shalt.err (!%p796_p12)
}
  0x49   : > { %s877_s23 = smov 512   ;;  %s878_s26 = smov 128  }
  0x4a   : > { %s879_s28 = smov 8   ;;  %250 = sbr.rel (%p990_p4) target bundleno = 378 (0x17a), region = 44 }
  0x4b   : > { %687 = dma.hbm_to_vmem [thread:$0]  (!%p1009_p8), %s1021_s21, 1024, %s1023_s13, %s1025_s27, %s877_s23, %s878_s26, %s879_s28  }
  0x4c   : > { %p1194_p10 = scmp.eq.s32.totalorder (!%p990_p4), %s951_s9, 0 }
  0x51   : > { %847 = dma.done.wait (%p1194_p10), [#allocation7], 16   ;;  %p1195_p3 = pmov %p1194_p10 }
  0x52   : > { %s1060_s10 = sand.u32 1, %s864_s0   ;;  %p1196_p11 = scmp.ne.s32.totalorder %s1188_s16, 0 }
  0x53   : > { %849 = vsyncadd (%p1195_p3), [#allocation7], 4294967280  ;;  %s615_s12 = sshll.u32 %s1060_s10, 6  ;;  %s257_s24 = scalar_lea.sflag [#allocation5], %s1060_s10 }
  0x54   : > { %s1064_s15 = scalar_lea.vmem [#allocation8], %s615_s12 }
  0x55   : > { %851 = dma.done.wait (%p1196_p11), %s257_s24, 1024  }
  0x56   : > { %853 = vsyncadd (%p1196_p11), %s257_s24, 4294966272 }
  0x57   : > { %265 = sfence }
  0x58   : > { %s616_s19 = sshll.u32 %s1060_s10, 3  ;;  %s1071_s25 = sld [smem:[#allocation4]]  ;;  %v293_v0 = vld [vmem:[%s1064_s15] sm:$0xff]  ;;  %v294_v1 = vld [vmem:[%s1064_s15 + $0x8] sm:$0xff]  ;;  %v880_v2 = vmov 0.0|0.0   ;;  %v295_v6 = vld [vmem:[%s1064_s15 + $0x10] sm:$0xff] }
  0x59   : > { %s1075_s13 = sld [smem:[#allocation4 + $0x1]]  ;;  %660 = vmatprep.subr.bf16.mxu0 %v880_v2  ;;  %v303_v3 = vmul.f32 %v293_v0, %v293_v0  ;;  %v304_v4 = vmul.f32 %v294_v1, %v294_v1  ;;  %v661_v5 = vpack.c.bf16 %v294_v1, %v293_v0  ;;  %v296_v7 = vld [vmem:[%s1064_s15 + $0x18] sm:$0xff]  ;;  %v305_v8 = vmul.f32 %v295_v6, %v295_v6  ;;  %v297_v12 = vld [vmem:[%s1064_s15 + $0x20] sm:$0xff]  ;;  %v298_v13 = vld [vmem:[%s1064_s15 + $0x28] sm:$0xff]  ;;  %s416_s26 = sld [smem:[#allocation3]] }
  0x5a   : > { %v306_v10 = vmul.f32 %v296_v7, %v296_v7  ;;  %v664_v11 = vpack.c.bf16 %v296_v7, %v295_v6  ;;  %v302_v14 = vld [vmem:[%s1180_s4] sm:$0xff]  ;;  %v307_v16 = vmul.f32 %v297_v12, %v297_v12  ;;  %vm881_vm0 = vmmov 0   ;;  %v299_v22 = vld [vmem:[%s1064_s15 + $0x30] sm:$0xff]  ;;  %v300_v23 = vld [vmem:[%s1064_s15 + $0x38] sm:$0xff]  ;;  %s621_s28 = sld [smem:[#allocation3 + $0x1]]  ;;  %s622_s12 = sld [smem:[#allocation3 + $0x2]] }
  0x5b   : > { %v311_v9 = vadd.f32 %v304_v4, %v303_v3  ;;  %662 = vmatpush3.bf16.msra.mxu0 %v661_v5  ;;  %v882_v17 = vmov 0.0   ;;  %v883_v18 = vmov 0   ;;  %v308_v20 = vmul.f32 %v298_v13, %v298_v13  ;;  %v301_v24 = vld [vmem:[%s1179_s3] sm:$0xff]  ;;  %s1093_s24 = sshll.u32 %s951_s9, 7  ;;  %s623_s15 = sld [smem:[#allocation3 + $0x3]] }
  0x5c   : > { %663 = vmatprep.subr.bf16.mxu0 %v880_v2  ;;  %657 = vmatprep.mubr.msk.f32.mxu0 %vm881_vm0, %v882_v17  ;;  %v667_v21 = vpack.c.bf16 %v298_v13, %v297_v12  ;;  %v309_v26 = vmul.f32 %v299_v22, %v299_v22  ;;  %v310_v28 = vmul.f32 %v300_v23, %v300_v23  ;;  %v292_v32 = vld [vmem:[%s1178_s2] sm:$0xff]  ;;  %vm326_vm1 = vcmask 523264   ;;  %s1096_s16 = sadd.s32 128, %s1093_s24  ;;  %s624_s9 = sld [smem:[#allocation3 + $0x4]] }
  0x5d   : > { %v312_v15 = vadd.f32 %v311_v9, %v305_v8  ;;  %739 = vset.pattern.permute.xlu0 %v883_v18  ;;  %v670_v29 = vpack.c.bf16 %v300_v23, %v299_v22  ;;  %s625_s21 = sld [smem:[#allocation3 + $0x5]]  ;;  %s626_s27 = sld [smem:[#allocation3 + $0x6]] }
  0x5e   : > { %402 = vperm.xlu0 %739, %v302_v14   ;;  %s627_s20 = sld [smem:[#allocation3 + $0x7]]  ;;  %s1120_s23 = scalar_lea.vmem [#allocation9], %s616_s19 }
  0x5f   : > { %v313_v19 = vadd.f32 %v312_v15, %v306_v10  ;;  %665 = vmatpush3.bf16.msra.mxu0 %v664_v11  ;;  %p417_p4 = scmp.ge.s32.totalorder %s416_s26, %s1093_s24  ;;  %p419_p8 = scmp.lt.s32.totalorder %s416_s26, %s1096_s16 }
  0x60   : > { %666 = vmatprep.subr.bf16.mxu0 %v880_v2  ;;  %p423_p13 = scmp.ge.s32.totalorder %s621_s28, %s1093_s24  ;;  %p424_p0 = scmp.lt.s32.totalorder %s621_s28, %s1096_s16 }
  0x61   : > { %v314_v25 = vadd.f32 %v313_v19, %v307_v16  ;;  %p420_p1 = pnand %p419_p8, %p417_p4  ;;  %p429_p6 = scmp.ge.s32.totalorder %s622_s12, %s1093_s24 }
  0x62   : > { %411 = vperm.xlu0 %739, %v301_v24   ;;  %p425_p9 = pnand %p424_p0, %p423_p13  ;;  %p430_p2 = scmp.lt.s32.totalorder %s622_s12, %s1096_s16 }
  0x63   : > { %v315_v27 = vadd.f32 %v314_v25, %v308_v20  ;;  %668 = vmatpush3.bf16.msra.mxu0 %v667_v21  ;;  %p421_p5 = pneg %p420_p1  ;;  %p435_p7 = scmp.ge.s32.totalorder %s623_s15, %s1093_s24 }
  0x64   : > { %669 = vmatprep.subr.bf16.mxu0 %v880_v2  ;;  %p426_p12 = pneg %p425_p9  ;;  %p431_p10 = pnand %p430_p2, %p429_p6 }
  0x65   : > { %v316_v30 = vadd.f32 %v315_v27, %v309_v26  ;;  %p436_p3 = scmp.lt.s32.totalorder %s623_s15, %s1096_s16  ;;  %p441_p1 = scmp.ge.s32.totalorder %s624_s9, %s1093_s24 }
  0x66   : > { %p427_p11 = por %p426_p12, %p421_p5  ;;  %p432_p4 = pneg %p431_p10 }
  0x67   : > { %v317_v31 = vadd.f32 %v316_v30, %v310_v28  ;;  %671 = vmatpush3.bf16.msra.mxu0 %v670_v29  ;;  %p437_p8 = pnand %p436_p3, %p435_p7  ;;  %p442_p2 = scmp.lt.s32.totalorder %s624_s9, %s1096_s16 }
  0x68   : > { %p433_p0 = por %p432_p4, %p427_p11  ;;  %p447_p6 = scmp.ge.s32.totalorder %s625_s21, %s1093_s24 }
  0x69   : > { %p438_p13 = pneg %p437_p8  ;;  %p448_p5 = scmp.lt.s32.totalorder %s625_s21, %s1096_s16  ;;  %v318_v33 = vrot.slane %v317_v31, 4 }
  0x6a   : > { %658 = vmatmul.mubr.msk.f32.vlgmr.msra.gmra.mrb[0].mxu0 %vm326_vm1, %v292_v32  ;;  %p443_p12 = pnand %p442_p2, %p441_p1  ;;  %p453_p10 = scmp.ge.s32.totalorder %s626_s27, %s1093_s24 }
  0x6b   : > { %p439_p9 = por %p438_p13, %p433_p0  ;;  %p449_p3 = pnand %p448_p5, %p447_p6  ;;  %v319_v34 = vadd.f32 %v318_v33, %v317_v31 }
  0x6c   : > { %p454_p7 = scmp.lt.s32.totalorder %s626_s27, %s1096_s16  ;;  %p444_p4 = pneg %p443_p12 }
  0x6d   : > { %p459_p11 = scmp.ge.s32.totalorder %s627_s20, %s1093_s24  ;;  %p450_p8 = pneg %p449_p3  ;;  %v320_v35 = vrot.slane %v319_v34, 2 }
  0x6e   : > { %p455_p0 = pnand %p454_p7, %p453_p10  ;;  %p445_p13 = por %p444_p4, %p439_p9 }
  0x6f   : > { %p460_p1 = scmp.lt.s32.totalorder %s627_s20, %s1096_s16  ;;  %v321_v36 = vadd.f32 %v320_v35, %v319_v34 }
  0x70   : > { %p456_p2 = pneg %p455_p0  ;;  %p451_p5 = por %p450_p8, %p445_p13 }
  0x71   : > { %p461_p6 = pnand %p460_p1, %p459_p11  ;;  %v322_v37 = vrot.slane %v321_v36, 1 }
  0x72   : > { %p457_p12 = por %p456_p2, %p451_p5 }
  0x73   : > { %p462_p3 = pneg %p461_p6  ;;  %v323_v38 = vadd.f32 %v322_v37, %v321_v36 }
  0x75   : > { %p1114_p7 = por %p462_p3, %p457_p12  ;;  %v324_v39 = vmax.f32 %v323_v38, 1e-24 }
  0x76   : > { %v884_v49 = vmov (%p1114_p7), 0   ;;  %v499_v50 = vld [vmem:[%s1181_s5] sm:$0xff] (%p1114_p7)  ;;  %v885_v1 = vmov (%p1114_p7), -1.0   ;;  %v490_v5 = vstv (%p1114_p7), %s1071_s25  ;;  %v495_v6 = vlaneseq (%p1114_p7) }
  0x77   : > { %740 = vrsqrt.f32 %v324_v39  ;;  %742 = vset.pattern.permute.xlu0 (%p1114_p7), %v884_v49  ;;  %v497_v10 = vstv (%p1114_p7), %s1093_s24  ;;  %v493_v12 = vstv (%p1114_p7), %s1075_s13 }
  0x78   : > { %501 = vperm.xlu0 (%p1114_p7), %742, %v499_v50   ;;  %v496_v9 = vand.u32 (%p1114_p7), 127, %v495_v6 }
  0x7a   : > { %v498_v13 = vadd.s32 (%p1114_p7), %v497_v10, %v496_v9 }
  0x81   : > { %v741_v40 = vpop.eup %740 }
  0xdd   : > { %v403_v41 = vpop.permute.xlu0 %402 }
  0xde   : > { %v405_v42 = vmul.f32 %v741_v40, %v403_v41 }
  0xe1   : > { %v412_v47 = vpop.permute.xlu0 %411 }
  0xf7   : > { %v502_v15 = vpop.permute.xlu0 (%p1114_p7), %501 }
  0xf8   : > { %vm503_vm7 = vcmp.eq.s32.totalorder (%p1114_p7), %v498_v13, %v502_v15 }
 0x13c   : > { %466 = sbr.rel (!%p1114_p7) target bundleno = 346 (0x15a), region = 56 }
 0x13d   : > { %v396_v43 = vpop.f32.mrb[0].mxu0 }
 0x13e   : > { %v406_v44 = vmul.f32 %v405_v42, %v396_v43  ;;  %v659_v45 = vpop.f32.mrb[1].mxu0 }
 0x140   : > { %v619_v46 = vclamps-f32 %v406_v44, 1.0 }
 0x142   : > { %v414_v48 = vmul.f32 %v619_v46, %v412_v47  ;;  %vm474_vm2 = vcmp.le.f32.partialorder (%p1114_p7), %v619_v46, 6.123234e-17  ;;  %vm472_vm3 = vcmp.le.f32.partialorder (%p1114_p7), %v619_v46, 0.70710677  ;;  %vm477_vm4 = vcmp.le.f32.partialorder (%p1114_p7), %v619_v46, -0.70710677 }
 0x143   : > { %v473_v51 = vsel %vm472_vm3, 1, %v884_v49  ;;  %v475_v52 = vsel %vm474_vm2, 1, %v884_v49  ;;  %v478_v54 = vsel %vm477_vm4, 1, %v884_v49  ;;  %vm480_vm5 = vcmp.le.f32.partialorder %v619_v46, -1.0 }
 0x144   : > { %v476_v53 = vadd.s32 %v475_v52, %v473_v51  ;;  %v467_v55 = vmul.f32 %v619_v46, %v619_v46  ;;  %v481_v57 = vsel %vm480_vm5, 1, %v884_v49  ;;  %v491_v7 = vmul.f32 %v619_v46, %v490_v5 }
 0x146   : > { %v479_v56 = vadd.s32 %v478_v54, %v476_v53  ;;  %v468_v58 = vmul.f32 8.0, %v467_v55 }
 0x148   : > { %v482_v59 = vadd.s32 %v481_v57, %v479_v56  ;;  %v469_v60 = vmul.f32 %v468_v58, %v467_v55 }
 0x14a   : > { %v484_v61 = vand.u32 1, %v482_v59  ;;  %v470_v62 = vsub.f32 %v469_v60, %v468_v58  ;;  %v483_v0 = vcvt.s32.f32 %v482_v59 }
 0x14c   : > { %vm485_vm6 = vcmp.eq.s32.totalorder %v484_v61, 0  ;;  %v471_v63 = vadd.f32 1.0, %v470_v62  ;;  %v488_v4 = vmul.f32 2.0, %v483_v0 }
 0x14d   : > { %v486_v2 = vsel %vm485_vm6, 1.0, %v885_v1 }
 0x14e   : > { %v487_v3 = vmul.f32 %v486_v2, %v471_v63 }
 0x150   : > { %v489_v8 = vsub.f32 %v487_v3, %v488_v4 }
 0x152   : > { %v492_v11 = vadd.f32 %v491_v7, %v489_v8 }
 0x154   : > { %v494_v14 = vmul.f32 %v493_v12, %v492_v11 }
 0x156   : > { %v504_v16 = vsel %vm503_vm7, %v494_v14, %v619_v46 }
 0x157   : > { %v505_v17 = vmul.f32 %v504_v16, %v412_v47 }
 0x159   : > { %506 = vst [vmem:[%s1120_s23] sm:$0xff] %v505_v17 }
 0x15a PF: > { %509 = sbr.rel (%p1114_p7) target bundleno = 353 (0x161), region = 60  ;;  %510 = vst [vmem:[%s1120_s23] sm:$0xff] (!%p1114_p7), %v414_v48 }
 0x161 PF: > { %s1138_s13 = scalar_lea.hbm %s1183_s7, %s1093_s24  ;;  %s525_s12 = sshll.u32 %s1120_s23, 4  ;;  %s526_s12 = int_to_ptr.vmem [resolvable:$true] %s525_s12 }
 0x162   : > { %s512_s15 = scalar_lea.sflag [#allocation6], %s1060_s10  ;;  %s800_s16 = scalar_lea.vmem %s526_s12, 128 }
 0x163   : > { %p801_p9 = scmp.ne.s32.totalorder %s526_s12, %s800_s16  ;;  %p1198_p10 = scmp.ne.s32.totalorder %s1189_s17, 0 }
 0x164   : > { %s886_s9 = smov [#allocation9]  }
 0x165   : > { %p802_p4 = pnand %p801_p9, %p1198_p10  ;;  %s804_s21 = sshll.u32 %s886_s9, 4  ;;  %s805_s21 = int_to_ptr.vmem [resolvable:$false] %s804_s21 }
 0x166   : > { %s806_s27 = scalar_lea.vmem %s805_s21, 256  ;;  %p807_p8 = scmp.lt.s32.totalorder %s526_s12, %s805_s21 }
 0x167   : > { %p803_p11 = pneg %p802_p4  ;;  %p808_p0 = scmp.lt.s32.totalorder %s806_s27, %s800_s16 }
 0x169   : > { %p809_p13 = por %p808_p0, %p807_p8 }
 0x16b   : > { %p810_p1 = pnand %p809_p13, %p803_p11 }
 0x16d   : > { %813 = shalt.err (!%p810_p1)
}
 0x16e   : > { %s814_s10 = scalar_lea.hbm %s1138_s13, 128  ;;  %s818_s22 = scalar_lea.hbm %s1183_s7, 512 }
 0x16f   : > { %p815_p2 = scmp.ne.s32.totalorder %s1138_s13, %s814_s10  ;;  %p819_p12 = scmp.lt.u32.totalorder %s1138_s13, %s1183_s7 }
 0x170   : > { %p820_p3 = scmp.lt.u32.totalorder %s818_s22, %s814_s10  ;;  %p822_p9 = scmp.lt.u32.totalorder %s814_s10, %s1138_s13 }
 0x171   : > { %p816_p5 = pnand %p815_p2, %p1198_p10 }
 0x172   : > { %p821_p7 = por %p820_p3, %p819_p12 }
 0x173   : > { %p817_p6 = pneg %p816_p5 }
 0x174   : > { %p823_p4 = por %p822_p9, %p821_p7 }
 0x176   : > { %p824_p11 = pnand %p823_p4, %p817_p6 }
 0x178   : > { %827 = shalt.err (!%p824_p11)
}
 0x179   : > { %678 = dma.vmem_to_hbm [thread:$0]  (%p1198_p10), %s526_s12, 128, %s1138_s13, %s512_s15  }
 0x17a PF: > { %p695_p8 = scmp.ge.s32.totalorder %s872_s8, 2  ;;  %s537_s28 = sand.u32 1, %s860_s29  }
 0x17b   : > { %p1199_p0 = scmp.ne.s32.totalorder %s1190_s18, 0  ;;  %s538_s19 = scalar_lea.sflag [#allocation6], %s537_s28 }
 0x17d   : > { %p689_p13 = pnand %p695_p8, %p1199_p0 }
 0x17f   : > { %855 = dma.done.wait (!%p689_p13), %s538_s19, 128  }
 0x180   : > { %857 = vsyncadd (!%p689_p13), %s538_s19, 4294967168  ;;  %p27_p1 = scmp.ge.s32.totalorder %s955_s11, 6   ;;  %s1200_s29 = smov %s864_s0 }
 0x181   : > { %s1201_s0 = smov %s868_s30  ;;  %s1202_s30 = smov %s967_s14 }
 0x182   : > { %s1203_s8 = smov %s955_s11  ;;  %29 = sbr.rel (!%p27_p1) target bundleno = 21 (0x15), region = 102 }
 0x189   :  { %543 = vsyncpa [#allocation5], 1 }
 0x18a   :  { %545 = vsyncpa [#allocation5 + $0x1], 1 }
 0x18b   :  { %546 = vsyncpa [#allocation6], 1 }
 0x18c   :  { %548 = vsyncpa [#allocation6 + $0x1], 1 }
 0x18d   :  { %549 = vsyncpa [#allocation7], 1 }
 0x18e   :  { %551 = vsyncpa [#allocation7 + $0x1], 1 }

</bundles_post_ra>
